<compile_context>
chip_gen: v7x
topology: tpu7x:2x2x1
jax: 0.10.0
libtpu: 0.0.40
codegen_flags: <defaults>
</compile_context>

<pallas_src>
import jax
import jax.numpy as jnp
from jax import lax
from jax.experimental import pallas as pl
from jax.experimental.pallas import tpu as pltpu


# ----------------------------------------------------------------------------- kernels
def _cov_kernel(xr_ref, xi_ref, rr_ref, ri_ref):
    """R = X X^H / L on real/imag planes.  Whole batch in one grid step.

    NT contraction (contract axis 1 of both operands) so the MXU consumes the
    transposed RHS natively -- no XLU transpose, no pre-transposed HBM copies.
    """
    B, _, L = xr_ref.shape
    inv_l = 1.0 / L
    nt = (((1,), (1,)), ((), ()))          # X @ X^T style contraction
    for b in range(B):                     # static unroll; B is tiny
        xr = xr_ref[b]                     # (m, L)
        xi = xi_ref[b]                     # (m, L)
        rr = (lax.dot_general(xr, xr, nt, preferred_element_type=jnp.float32)
              + lax.dot_general(xi, xi, nt, preferred_element_type=jnp.float32))
        ri = (lax.dot_general(xi, xr, nt, preferred_element_type=jnp.float32)
              - lax.dot_general(xr, xi, nt, preferred_element_type=jnp.float32))
        rr_ref[b] = rr * inv_l
        ri_ref[b] = ri * inv_l


def _spectrum_kernel(vr_ref, vi_ref, s_ref, ar_ref, ai_ref, out_ref):
    """M = Un^H @ A for all batches stacked along rows; spectrum = 1/sum|M|^2.

    vr/vi: (B*m, m)  stacked real/imag of conj-transposed (masked) noise subspaces
    s:     (B, B*m)  per-batch row-segment selector (sums m rows per batch)
    ar/ai: (m, TG)   real/imag steering vectors for this grid tile
    out:   (B, TG)
    """
    vr = vr_ref[...]
    vi = vi_ref[...]
    ar = ar_ref[...]
    ai = ai_ref[...]
    mr = (jnp.dot(vr, ar, preferred_element_type=jnp.float32)
          + jnp.dot(vi, ai, preferred_element_type=jnp.float32))
    mi = (jnp.dot(vr, ai, preferred_element_type=jnp.float32)
          - jnp.dot(vi, ar, preferred_element_type=jnp.float32))
    pw = mr * mr + mi * mi                                            # (B*m, TG)
    den = jnp.dot(s_ref[...], pw, preferred_element_type=jnp.float32)  # (B, TG)
    # EUP reciprocal (free bundle slot).  Use approx=False if bit-level parity
    # with the f32 divide of the reference is required (~1e-3 rel. difference).
    out_ref[...] = pl.reciprocal(den, approx=True)


# ----------------------------------------------------------------------------- wrappers
def _compute_covariance(Xr, Xi):
    B, m, L = Xr.shape
    # Single kernel invocation (no grid): the whole (B, m, L) slab is only a few
    # KB, so per-grid-step pipeline overhead would dominate any tiling.
    return pl.pallas_call(
        _cov_kernel,
        out_shape=(jax.ShapeDtypeStruct((B, m, m), jnp.float32),
                   jax.ShapeDtypeStruct((B, m, m), jnp.float32)),
    )(Xr, Xi)


def _choose_spectrum_tile(Gp):
    """Lane-dense tile (multiple of 128), capped, >=2 grid steps when possible
    so v7x's two TensorCores both get work (v5e/v6e are single-TC)."""
    if Gp <= 128:
        return Gp
    tg = max(128, min(2048, (Gp // 2) // 128 * 128))
    while Gp % tg:
        tg -= 128
    return tg


def _compute_spectrum(Vr_stack, Vi_stack, S, Ar, Ai):
    Bm, m = Vr_stack.shape
    B = S.shape[0]
    G = Ar.shape[1]

    # Pad the grid axis to a multiple of 128 so every output store is a full,
    # unmasked lane-dense slab; the padded tail is sliced off afterwards.
    Gp = ((G + 127) // 128) * 128
    if Gp != G:
        pad = Gp - G
        Ar = jnp.pad(Ar, ((0, 0), (0, pad)))
        Ai = jnp.pad(Ai, ((0, 0), (0, pad)))

    tg = _choose_spectrum_tile(Gp)
    out = pl.pallas_call(
        _spectrum_kernel,
        out_shape=jax.ShapeDtypeStruct((B, Gp), jnp.float32),
        grid=(Gp // tg,),
        in_specs=[pl.BlockSpec((Bm, m), lambda g: (0, 0)),
                  pl.BlockSpec((Bm, m), lambda g: (0, 0)),
                  pl.BlockSpec((B, Bm), lambda g: (0, 0)),
                  pl.BlockSpec((m, tg), lambda g: (0, g)),
                  pl.BlockSpec((m, tg), lambda g: (0, g))],
        out_specs=pl.BlockSpec((B, tg), lambda g: (0, g)),
        compiler_params=pltpu.CompilerParams(dimension_semantics=("parallel",)),
    )(Vr_stack, Vi_stack, S, Ar, Ai)
    return out[:, :G]


def make_steering(xgrid, m):
    """Precompute steering matrices a(f)[i] = exp(2j*pi*f*i) once per xgrid.

    xgrid is a module parameter, so callers should hoist this out of the
    per-forward path (saves 2*m*G transcendentals + 2 HBM materializations)."""
    xgrid = jnp.asarray(xgrid, dtype=jnp.float32)
    phase = 2.0 * jnp.pi * jnp.arange(m, dtype=jnp.float32)[:, None] * xgrid[None, :]
    return jnp.cos(phase).astype(jnp.float32), jnp.sin(phase).astype(jnp.float32)


def _sorte_nfreqs(eig_desc):
    """SORTE model-order estimator on descending eigenvalues (vectorized over batch)."""
    B, m = eig_desc.shape
    d = eig_desc[:, :-1] - eig_desc[:, 1:]                 # eigenvalue gaps, (B, m-1)
    n = m - 1
    i = jnp.arange(n)
    starts = jnp.arange(n)
    mask = (i[None, :] >= starts[:, None]).astype(eig_desc.dtype)   # (n, n): gaps >= start
    count = (n - starts).astype(eig_desc.dtype)
    mean = (d[:, None, :] * mask[None]).sum(-1) / count             # (B, n)
    var = (((d[:, None, :] - mean[..., None]) ** 2) * mask[None]).sum(-1) / count
    K = jnp.arange(1, m - 2)                               # hypothesized #sources 1..m-3
    num = var[:, K]
    den = var[:, K - 1]
    score = jnp.where(den > 0, num / den, jnp.inf)
    return K[jnp.argmin(score, axis=1)]                    # (B,) int32


def music_forward(x, xgrid, m=20, param=20, steering=None):
    """Equivalent of MUSIC.forward: x (B, 2, N) -> pseudo-spectrum (B, len(xgrid))."""
    B, _, N = x.shape
    xr, xi = x[:, 0], x[:, 1]
    L = N - m + 1
    idx = jnp.arange(m)[:, None] + jnp.arange(L)[None, :]  # Hankel snapshot indices
    Xr = xr[:, idx].astype(jnp.float32)                    # (B, m, L)
    Xi = xi[:, idx].astype(jnp.float32)

    # (1) sample covariance  -- Pallas (batch fused, NT contraction on MXU)
    Rr, Ri = _compute_covariance(Xr, Xi)
    R = (Rr + 1j * Ri).astype(jnp.complex64)

    # TODO(synk): Hermitian eigendecomposition has no Pallas primitive; kept in plain JAX.
    w, V = jnp.linalg.eigh(R)            # ascending eigenvalues, columns = eigenvectors
    lam = w[:, ::-1]                     # descending

    # TODO(synk): exact sorte_arr_torch semantics / use of `param` unavailable; standard SORTE used.
    nfreqs = _sorte_nfreqs(lam)          # (B,) estimated number of sources

    # noise subspace = eigenvectors of the (m - nfreq) smallest eigenvalues (mask columns)
    noise_mask = (jnp.arange(m)[None, :] < (m - nfreqs)[:, None]).astype(jnp.float32)
    Wn = V * noise_mask[:, None, :]                                   # (B, m, m) complex
    # Stack conj-transposed noise subspaces along the matmul M axis: (B*m, m)
    Vr_stack = jnp.real(Wn).transpose(0, 2, 1).reshape(B * m, m).astype(jnp.float32)
    Vi_stack = jnp.imag(Wn).transpose(0, 2, 1).reshape(B * m, m).astype(jnp.float32)
    # per-batch row-segment selector for the |M|^2 reduction
    S = (jnp.arange(B * m)[None, :] // m
         == jnp.arange(B)[:, None]).astype(jnp.float32)               # (B, B*m)

    # steering vectors (precomputed/cached per xgrid when `steering` is passed)
    if steering is None:
        Ar, Ai = make_steering(xgrid, m)
    else:
        Ar, Ai = steering

    # (2) MUSIC pseudo-spectrum -- Pallas
    return _compute_spectrum(Vr_stack, Vi_stack, S, Ar, Ai)


# ----------------------------------------------------------------------------- main
if __name__ == "__main__":
    B, N, m, G = 2, 64, 20, 256

    key = jax.random.PRNGKey(0)
    kf, kp, kn1, kn2 = jax.random.split(key, 4)
    nsrc = 3
    freqs = jax.random.uniform(kf, (B, nsrc), minval=-0.5, maxval=0.5)
    phases = jax.random.uniform(kp, (B, nsrc), minval=0.0, maxval=2.0 * jnp.pi)
    t = jnp.arange(N, dtype=jnp.float32)
    sig = jnp.exp(1j * (2.0 * jnp.pi * freqs[..., None] * t[None, None, :]
                        + phases[..., None])).sum(axis=1)                 # (B, N) complex
    noise = 0.05 * (jax.random.normal(kn1, (B, N)) + 1j * jax.random.normal(kn2, (B, N)))
    z = sig + noise
    x = jnp.stack([jnp.real(z), jnp.imag(z)], axis=1).astype(jnp.float32)  # (B, 2, N)

    # module's xgrid parameter (deterministic init); steering tables hoisted/cached once
    xgrid = jnp.linspace(-0.5, 0.5, G, endpoint=False).astype(jnp.float32)
    steering = make_steering(xgrid, m)

    spectrum = music_forward(x, xgrid, m=m, param=20, steering=steering)
    spectrum = jax.block_until_ready(spectrum)

    assert spectrum.shape == (B, G)
    assert bool(jnp.all(jnp.isfinite(spectrum)))
    print("KERNEL_OK")
</pallas_src>

<mosaic_0001>
module attributes {stable_mosaic.version = 11 : i64} {
  func.func @_cov_kernel(%arg0: memref<2x20x45xf32, #tpu.memory_space<vmem>>, %arg1: memref<2x20x45xf32, #tpu.memory_space<vmem>>, %arg2: memref<2x20x20xf32, #tpu.memory_space<vmem>>, %arg3: memref<2x20x20xf32, #tpu.memory_space<vmem>>) attributes {dimension_semantics = [], scalar_prefetch = 0 : i64, scratch_operands = 0 : i64, tpu.core_type = #tpu.core_type<tc>} {
    %c0 = arith.constant 0 : index
    %c0_0 = arith.constant 0 : index
    %c0_1 = arith.constant 0 : index
    %0 = vector.load %arg0[%c0, %c0_0, %c0_1] : memref<2x20x45xf32, #tpu.memory_space<vmem>>, vector<1x20x45xf32>
    %1 = vector.shape_cast %0 : vector<1x20x45xf32> to vector<20x45xf32>
    %c0_2 = arith.constant 0 : index
    %c0_3 = arith.constant 0 : index
    %c0_4 = arith.constant 0 : index
    %2 = vector.load %arg1[%c0_2, %c0_3, %c0_4] : memref<2x20x45xf32, #tpu.memory_space<vmem>>, vector<1x20x45xf32>
    %3 = vector.shape_cast %2 : vector<1x20x45xf32> to vector<20x45xf32>
    %cst = arith.constant dense<0.000000e+00> : vector<20x20xf32>
    %4 = tpu.matmul %1, %1, %cst {dimension_numbers = #tpu.dot_dimension_numbers<[1], [1], [0], [0], [0, 0, 1, 0], [], []>} : vector<20x45xf32>, vector<20x45xf32>, vector<20x20xf32> -> vector<20x20xf32>
    %cst_5 = arith.constant dense<0.000000e+00> : vector<20x20xf32>
    %5 = tpu.matmul %3, %3, %cst_5 {dimension_numbers = #tpu.dot_dimension_numbers<[1], [1], [0], [0], [0, 0, 1, 0], [], []>} : vector<20x45xf32>, vector<20x45xf32>, vector<20x20xf32> -> vector<20x20xf32>
    %6 = arith.addf %4, %5 : vector<20x20xf32>
    %cst_6 = arith.constant dense<0.000000e+00> : vector<20x20xf32>
    %7 = tpu.matmul %3, %1, %cst_6 {dimension_numbers = #tpu.dot_dimension_numbers<[1], [1], [0], [0], [0, 0, 1, 0], [], []>} : vector<20x45xf32>, vector<20x45xf32>, vector<20x20xf32> -> vector<20x20xf32>
    %cst_7 = arith.constant dense<0.000000e+00> : vector<20x20xf32>
    %8 = tpu.matmul %1, %3, %cst_7 {dimension_numbers = #tpu.dot_dimension_numbers<[1], [1], [0], [0], [0, 0, 1, 0], [], []>} : vector<20x45xf32>, vector<20x45xf32>, vector<20x20xf32> -> vector<20x20xf32>
    %9 = arith.subf %7, %8 : vector<20x20xf32>
    %cst_8 = arith.constant 0.0222222228 : f32
    %10 = vector.broadcast %cst_8 : f32 to vector<20x20xf32>
    %11 = arith.mulf %6, %10 : vector<20x20xf32>
    %c0_9 = arith.constant 0 : index
    %c0_10 = arith.constant 0 : index
    %c0_11 = arith.constant 0 : index
    %12 = vector.load %arg2[%c0_9, %c0_10, %c0_11] : memref<2x20x20xf32, #tpu.memory_space<vmem>>, vector<1x20x20xf32>
    %13 = vector.shape_cast %12 : vector<1x20x20xf32> to vector<20x20xf32>
    %14 = vector.shape_cast %11 : vector<20x20xf32> to vector<1x20x20xf32>
    tpu.vector_store %arg2[%c0_9, %c0_10, %c0_11], %14 {strides = array<i32>} : memref<2x20x20xf32, #tpu.memory_space<vmem>>, vector<1x20x20xf32>,
    %cst_12 = arith.constant 0.0222222228 : f32
    %15 = vector.broadcast %cst_12 : f32 to vector<20x20xf32>
    %16 = arith.mulf %9, %15 : vector<20x20xf32>
    %c0_13 = arith.constant 0 : index
    %c0_14 = arith.constant 0 : index
    %c0_15 = arith.constant 0 : index
    %17 = vector.load %arg3[%c0_13, %c0_14, %c0_15] : memref<2x20x20xf32, #tpu.memory_space<vmem>>, vector<1x20x20xf32>
    %18 = vector.shape_cast %17 : vector<1x20x20xf32> to vector<20x20xf32>
    %19 = vector.shape_cast %16 : vector<20x20xf32> to vector<1x20x20xf32>
    tpu.vector_store %arg3[%c0_13, %c0_14, %c0_15], %19 {strides = array<i32>} : memref<2x20x20xf32, #tpu.memory_space<vmem>>, vector<1x20x20xf32>,
    %c1 = arith.constant 1 : index
    %c0_16 = arith.constant 0 : index
    %c0_17 = arith.constant 0 : index
    %20 = vector.load %arg0[%c1, %c0_16, %c0_17] : memref<2x20x45xf32, #tpu.memory_space<vmem>>, vector<1x20x45xf32>
    %21 = vector.shape_cast %20 : vector<1x20x45xf32> to vector<20x45xf32>
    %c1_18 = arith.constant 1 : index
    %c0_19 = arith.constant 0 : index
    %c0_20 = arith.constant 0 : index
    %22 = vector.load %arg1[%c1_18, %c0_19, %c0_20] : memref<2x20x45xf32, #tpu.memory_space<vmem>>, vector<1x20x45xf32>
    %23 = vector.shape_cast %22 : vector<1x20x45xf32> to vector<20x45xf32>
    %cst_21 = arith.constant dense<0.000000e+00> : vector<20x20xf32>
    %24 = tpu.matmul %21, %21, %cst_21 {dimension_numbers = #tpu.dot_dimension_numbers<[1], [1], [0], [0], [0, 0, 1, 0], [], []>} : vector<20x45xf32>, vector<20x45xf32>, vector<20x20xf32> -> vector<20x20xf32>
    %cst_22 = arith.constant dense<0.000000e+00> : vector<20x20xf32>
    %25 = tpu.matmul %23, %23, %cst_22 {dimension_numbers = #tpu.dot_dimension_numbers<[1], [1], [0], [0], [0, 0, 1, 0], [], []>} : vector<20x45xf32>, vector<20x45xf32>, vector<20x20xf32> -> vector<20x20xf32>
    %26 = arith.addf %24, %25 : vector<20x20xf32>
    %cst_23 = arith.constant dense<0.000000e+00> : vector<20x20xf32>
    %27 = tpu.matmul %23, %21, %cst_23 {dimension_numbers = #tpu.dot_dimension_numbers<[1], [1], [0], [0], [0, 0, 1, 0], [], []>} : vector<20x45xf32>, vector<20x45xf32>, vector<20x20xf32> -> vector<20x20xf32>
    %cst_24 = arith.constant dense<0.000000e+00> : vector<20x20xf32>
    %28 = tpu.matmul %21, %23, %cst_24 {dimension_numbers = #tpu.dot_dimension_numbers<[1], [1], [0], [0], [0, 0, 1, 0], [], []>} : vector<20x45xf32>, vector<20x45xf32>, vector<20x20xf32> -> vector<20x20xf32>
    %29 = arith.subf %27, %28 : vector<20x20xf32>
    %cst_25 = arith.constant 0.0222222228 : f32
    %30 = vector.broadcast %cst_25 : f32 to vector<20x20xf32>
    %31 = arith.mulf %26, %30 : vector<20x20xf32>
    %c1_26 = arith.constant 1 : index
    %c0_27 = arith.constant 0 : index
    %c0_28 = arith.constant 0 : index
    %32 = vector.load %arg2[%c1_26, %c0_27, %c0_28] : memref<2x20x20xf32, #tpu.memory_space<vmem>>, vector<1x20x20xf32>
    %33 = vector.shape_cast %32 : vector<1x20x20xf32> to vector<20x20xf32>
    %34 = vector.shape_cast %31 : vector<20x20xf32> to vector<1x20x20xf32>
    tpu.vector_store %arg2[%c1_26, %c0_27, %c0_28], %34 {strides = array<i32>} : memref<2x20x20xf32, #tpu.memory_space<vmem>>, vector<1x20x20xf32>,
    %cst_29 = arith.constant 0.0222222228 : f32
    %35 = vector.broadcast %cst_29 : f32 to vector<20x20xf32>
    %36 = arith.mulf %29, %35 : vector<20x20xf32>
    %c1_30 = arith.constant 1 : index
    %c0_31 = arith.constant 0 : index
    %c0_32 = arith.constant 0 : index
    %37 = vector.load %arg3[%c1_30, %c0_31, %c0_32] : memref<2x20x20xf32, #tpu.memory_space<vmem>>, vector<1x20x20xf32>
    %38 = vector.shape_cast %37 : vector<1x20x20xf32> to vector<20x20xf32>
    %39 = vector.shape_cast %36 : vector<20x20xf32> to vector<1x20x20xf32>
    tpu.vector_store %arg3[%c1_30, %c0_31, %c0_32], %39 {strides = array<i32>} : memref<2x20x20xf32, #tpu.memory_space<vmem>>, vector<1x20x20xf32>,
    return
  }
}

</mosaic_0001>

<bundles_post_ra>
// kernel: tpu_custom_call.1
= control target key start
LH: loop header
LB: loop body
LE: loop exit
PB: predicated region body
PF: predicated region fallthrough
CT: control target
= control target key end

     0   :  { %vm19_vm0 = vcmask 367616   ;;  %v1021_v0 = vmov 0.0|0.0   ;;  %vm1022_vm2 = vmmov 0   ;;  %v1023_v7 = vmov 0.0   ;;  %s1246_s1 = inlined_call_operand.vmem [shape: f32[2,20,45], index: 1, kind: input, shape index: {}]   ;;  %s1247_s0 = inlined_call_operand.vmem [shape: f32[2,20,45], index: 0, kind: input, shape index: {}]   ;;  %s1248_s2 = inlined_call_operand.vmem [shape: f32[2,20,20], index: 2, kind: output, shape index: {0}]   ;;  %s1249_s3 = inlined_call_operand.vmem [shape: f32[2,20,20], index: 3, kind: output, shape index: {1}]  }
   0x1   :  { %974 = vmatprep.subr.bf16.mxu0 %v1021_v0  ;;  %982 = vmatprep.subr.bf16.mxu1 %v1021_v0  ;;  %v16_v1 = vld [vmem:[%s1246_s1] sm:$0xff]  ;;  %v17_v2 = vld [vmem:[%s1246_s1 + $0x8] sm:$0xff]  ;;  %vm1054_vm1 = vmpackc.low %vm19_vm0, %vm19_vm0  ;;  %vm364_vm3 = vcmask 162816   ;;  %vm367_vm4 = vcmask 158720  }
   0x2   :  { %v975_v4 = vpack.c.bf16 %v17_v2, %v16_v1  ;;  %v13_v5 = vld [vmem:[%s1247_s0] sm:$0xff]  ;;  %v14_v6 = vld [vmem:[%s1247_s0 + $0x8] sm:$0xff]  ;;  %860 = vmatprep.mubr.msk.f32.mxu0 %vm1022_vm2, %v1023_v7  ;;  %890 = vmatprep.mubr.msk.f32.mxu1 %vm1022_vm2, %v1023_v7  ;;  %v18_v9 = vld [vmem:[%s1246_s1 + $0x10] sm:$0xf] }
   0x3   :  { %v979_v8 = vpack.c.bf16 %v14_v6, %v13_v5  ;;  %v15_v10 = vld [vmem:[%s1247_s0 + $0x10] sm:$0xf]  ;;  %v773_v11 = vld [vmem:[%s1246_s1 + $0x18] sm:$0xff]  ;;  %v774_v12 = vld [vmem:[%s1246_s1 + $0x20] sm:$0xff] }
   0x4   :  { %977 = vmatpush3.bf16.xpose.msk.msra.mxu0 %vm1054_vm1, %v975_v4  ;;  %v770_v13 = vld [vmem:[%s1247_s0 + $0x18] sm:$0xff]  ;;  %v771_v14 = vld [vmem:[%s1247_s0 + $0x20] sm:$0xff]  ;;  %v991_v15 = vpack.c.bf16 %v774_v12, %v773_v11  ;;  %v775_v17 = vld [vmem:[%s1246_s1 + $0x28] sm:$0xf] }
   0x5   :  { %985 = vmatpush3.bf16.xpose.msk.msra.mxu1 %vm1054_vm1, %v979_v8  ;;  %858 = vmatprep.subr.mxu0 %v1023_v7  ;;  %v995_v16 = vpack.c.bf16 %v771_v14, %v770_v13  ;;  %v772_v18 = vld [vmem:[%s1247_s0 + $0x28] sm:$0xf] }
   0x6   :  { %888 = vmatprep.subr.mxu1 %v1023_v7 }
   0xc   :  { %859 = vmatpush3.xpose.msk.msra.mxu0 %vm19_vm0, %v18_v9 }
   0xd   :  { %889 = vmatpush3.xpose.msk.msra.mxu1 %vm19_vm0, %v15_v10  ;;  %978 = vmatprep.subr.bf16.mxu0 %v1021_v0 }
   0xe   :  { %986 = vmatprep.subr.bf16.mxu1 %v1021_v0 }
   0xf   :  { %861 = vmatmul.mubr.msk.f32.vlgmr.msra.gmra.mrb[0].mxu0 %vm19_vm0, %v16_v1 }
  0x10   :  { %891 = vmatmul.mubr.msk.f32.vlgmr.msra.gmra.mrb[0].mxu1 %vm19_vm0, %v16_v1  ;;  %981 = vmatpush3.bf16.xpose.msk.msra.mxu0 %vm1054_vm1, %v979_v8 }
  0x11   :  { %989 = vmatpush3.bf16.xpose.msk.msra.mxu1 %vm1054_vm1, %v975_v4  ;;  %863 = vmatprep.mubr.msk.f32.mxu0 %vm1022_vm2, %v1023_v7 }
  0x12   :  { %893 = vmatprep.mubr.msk.f32.mxu1 %vm1022_vm2, %v1023_v7  ;;  %873 = vmatprep.subr.mxu0 %v1023_v7 }
  0x13   :  { %864 = vmatmul.mubr.msk.f32.gmra.mrb[2].mxu0 %vm19_vm0, %v17_v2  ;;  %903 = vmatprep.subr.mxu1 %v1023_v7 }
  0x14   :  { %894 = vmatmul.mubr.msk.f32.gmra.mrb[2].mxu1 %vm19_vm0, %v17_v2  ;;  %866 = vmatprep.mubr.msk.f32.mxu0 %vm1022_vm2, %v1023_v7 }
  0x15   :  { %896 = vmatprep.mubr.msk.f32.mxu1 %vm1022_vm2, %v1023_v7 }
  0x17   :  { %867 = vmatmul.mubr.msk.f32.gmra.mrb[4].mxu0 %vm19_vm0, %v18_v9 }
  0x18   :  { %897 = vmatmul.mubr.msk.f32.gmra.mrb[4].mxu1 %vm19_vm0, %v18_v9  ;;  %874 = vmatpush3.xpose.msk.msra.mxu0 %vm19_vm0, %v15_v10 }
  0x19   :  { %904 = vmatpush3.xpose.msk.msra.mxu1 %vm19_vm0, %v18_v9  ;;  %875 = vmatprep.mubr.msk.f32.mxu0 %vm1022_vm2, %v1023_v7 }
  0x1a   :  { %905 = vmatprep.mubr.msk.f32.mxu1 %vm1022_vm2, %v1023_v7  ;;  %990 = vmatprep.subr.bf16.mxu0 %v1021_v0 }
  0x1b   :  { %876 = vmatmul.mubr.msk.f32.vlgmr.msra.gmra.mrb[0].mxu0 %vm19_vm0, %v13_v5  ;;  %998 = vmatprep.subr.bf16.mxu1 %v1021_v0 }
  0x1c   :  { %906 = vmatmul.mubr.msk.f32.vlgmr.msra.gmra.mrb[6].mxu1 %vm19_vm0, %v13_v5  ;;  %993 = vmatpush3.bf16.xpose.msk.msra.mxu0 %vm1054_vm1, %v991_v15 }
  0x1d   :  { %1001 = vmatpush3.bf16.xpose.msk.msra.mxu1 %vm1054_vm1, %v995_v16  ;;  %878 = vmatprep.mubr.msk.f32.mxu0 %vm1022_vm2, %v1023_v7 }
  0x1e   :  { %908 = vmatprep.mubr.msk.f32.mxu1 %vm1022_vm2, %v1023_v7  ;;  %918 = vmatprep.subr.mxu0 %v1023_v7 }
  0x1f   :  { %879 = vmatmul.mubr.msk.f32.gmra.mrb[2].mxu0 %vm19_vm0, %v14_v6  ;;  %948 = vmatprep.subr.mxu1 %v1023_v7 }
  0x20   :  { %909 = vmatmul.mubr.msk.f32.gmra.mrb[8].mxu1 %vm19_vm0, %v14_v6  ;;  %881 = vmatprep.mubr.msk.f32.mxu0 %vm1022_vm2, %v1023_v7 }
  0x21   :  { %911 = vmatprep.mubr.msk.f32.mxu1 %vm1022_vm2, %v1023_v7 }
  0x23   :  { %882 = vmatmul.mubr.msk.f32.gmra.mrb[4].mxu0 %vm19_vm0, %v15_v10 }
  0x24   :  { %912 = vmatmul.mubr.msk.f32.gmra.mrb[10].mxu1 %vm19_vm0, %v15_v10  ;;  %919 = vmatpush3.xpose.msk.msra.mxu0 %vm19_vm0, %v775_v17 }
  0x25   :  { %949 = vmatpush3.xpose.msk.msra.mxu1 %vm19_vm0, %v772_v18  ;;  %920 = vmatprep.mubr.msk.f32.mxu0 %vm1022_vm2, %v1023_v7 }
  0x26   :  { %950 = vmatprep.mubr.msk.f32.mxu1 %vm1022_vm2, %v1023_v7  ;;  %994 = vmatprep.subr.bf16.mxu0 %v1021_v0 }
  0x27   :  { %921 = vmatmul.mubr.msk.f32.vlgmr.msra.gmra.mrb[6].mxu0 %vm19_vm0, %v773_v11  ;;  %1002 = vmatprep.subr.bf16.mxu1 %v1021_v0 }
  0x28   :  { %951 = vmatmul.mubr.msk.f32.vlgmr.msra.gmra.mrb[12].mxu1 %vm19_vm0, %v773_v11  ;;  %997 = vmatpush3.bf16.xpose.msk.msra.mxu0 %vm1054_vm1, %v995_v16 }
  0x29   :  { %1005 = vmatpush3.bf16.xpose.msk.msra.mxu1 %vm1054_vm1, %v991_v15  ;;  %923 = vmatprep.mubr.msk.f32.mxu0 %vm1022_vm2, %v1023_v7 }
  0x2a   :  { %953 = vmatprep.mubr.msk.f32.mxu1 %vm1022_vm2, %v1023_v7  ;;  %933 = vmatprep.subr.mxu0 %v1023_v7 }
  0x2b   :  { %924 = vmatmul.mubr.msk.f32.gmra.mrb[8].mxu0 %vm19_vm0, %v774_v12  ;;  %963 = vmatprep.subr.mxu1 %v1023_v7 }
  0x2c   :  { %954 = vmatmul.mubr.msk.f32.gmra.mrb[14].mxu1 %vm19_vm0, %v774_v12  ;;  %926 = vmatprep.mubr.msk.f32.mxu0 %vm1022_vm2, %v1023_v7 }
  0x2d   :  { %956 = vmatprep.mubr.msk.f32.mxu1 %vm1022_vm2, %v1023_v7 }
  0x2f   :  { %927 = vmatmul.mubr.msk.f32.gmra.mrb[10].mxu0 %vm19_vm0, %v775_v17 }
  0x30   :  { %957 = vmatmul.mubr.msk.f32.gmra.mrb[16].mxu1 %vm19_vm0, %v775_v17  ;;  %934 = vmatpush3.xpose.msk.msra.mxu0 %vm19_vm0, %v772_v18 }
  0x31   :  { %964 = vmatpush3.xpose.msk.msra.mxu1 %vm19_vm0, %v775_v17  ;;  %935 = vmatprep.mubr.msk.f32.mxu0 %vm1022_vm2, %v1023_v7 }
  0x32   :  { %965 = vmatprep.mubr.msk.f32.mxu1 %vm1022_vm2, %v1023_v7 }
  0x33   :  { %936 = vmatmul.mubr.msk.f32.vlgmr.msra.gmra.mrb[6].mxu0 %vm19_vm0, %v770_v13 }
  0x34   :  { %966 = vmatmul.mubr.msk.f32.vlgmr.msra.gmra.mrb[18].mxu1 %vm19_vm0, %v770_v13  ;;  %938 = vmatprep.mubr.msk.f32.mxu0 %vm1022_vm2, %v1023_v7 }
  0x35   :  { %968 = vmatprep.mubr.msk.f32.mxu1 %vm1022_vm2, %v1023_v7 }
  0x37   :  { %939 = vmatmul.mubr.msk.f32.gmra.mrb[8].mxu0 %vm19_vm0, %v771_v14 }
  0x38   :  { %969 = vmatmul.mubr.msk.f32.gmra.mrb[20].mxu1 %vm19_vm0, %v771_v14  ;;  %941 = vmatprep.mubr.msk.f32.mxu0 %vm1022_vm2, %v1023_v7 }
  0x39   :  { %971 = vmatprep.mubr.msk.f32.mxu1 %vm1022_vm2, %v1023_v7 }
  0x3b   :  { %942 = vmatmul.mubr.msk.f32.gmra.mrb[10].mxu0 %vm19_vm0, %v772_v18 }
  0x3c   :  { %972 = vmatmul.mubr.msk.f32.gmra.mrb[22].mxu1 %vm19_vm0, %v772_v18 }
  0xe3   :  { %v264_v19 = vpop.f32.mrb[0].mxu1 }
  0xe4   :  { %v892_v20 = vpop.f32.mrb[1].mxu1 }
  0xe7   :  { %v269_v21 = vpop.f32.mrb[2].mxu1 }
  0xe8   :  { %v895_v22 = vpop.f32.mrb[3].mxu1 }
  0xeb   :  { %v274_v23 = vpop.f32.mrb[4].mxu1 }
  0xec   :  { %v898_v24 = vpop.f32.mrb[5].mxu1 }
  0xee   :  { %v184_v25 = vpop.f32.mrb[0].mxu0 }
  0xef   :  { %v361_v26 = vmul.f32 0.022222223, %v184_v25  ;;  %v344_v27 = vpop.f32.mrb[6].mxu1  ;;  %v877_v28 = vpop.f32.mrb[1].mxu0 }
  0xf0   :  { %v358_v29 = vsub.f32 %v264_v19, %v344_v27  ;;  %v907_v30 = vpop.f32.mrb[7].mxu1 }
  0xf1   :  { %365 = vst.msk [vmem:[%s1248_s2] sm:$0xff] %vm364_vm3, %v361_v26 }
  0xf2   :  { %v369_v31 = vmul.f32 0.022222223, %v358_v29  ;;  %v189_v32 = vpop.f32.mrb[2].mxu0 }
  0xf3   :  { %v362_v33 = vmul.f32 0.022222223, %v189_v32  ;;  %v349_v34 = vpop.f32.mrb[8].mxu1  ;;  %v880_v35 = vpop.f32.mrb[3].mxu0 }
  0xf4   :  { %372 = vst.msk [vmem:[%s1249_s3] sm:$0xff] %vm364_vm3, %v369_v31  ;;  %v359_v36 = vsub.f32 %v269_v21, %v349_v34  ;;  %v910_v37 = vpop.f32.mrb[9].mxu1 }
  0xf5   :  { %366 = vst.msk [vmem:[%s1248_s2 + $0x8] sm:$0xff] %vm364_vm3, %v362_v33 }
  0xf6   :  { %v370_v38 = vmul.f32 0.022222223, %v359_v36  ;;  %v194_v39 = vpop.f32.mrb[4].mxu0 }
  0xf7   :  { %v363_v40 = vmul.f32 0.022222223, %v194_v39  ;;  %v354_v41 = vpop.f32.mrb[10].mxu1  ;;  %v883_v42 = vpop.f32.mrb[5].mxu0 }
  0xf8   :  { %373 = vst.msk [vmem:[%s1249_s3 + $0x8] sm:$0xff] %vm364_vm3, %v370_v38  ;;  %v360_v43 = vsub.f32 %v274_v23, %v354_v41  ;;  %v913_v44 = vpop.f32.mrb[11].mxu1 }
  0xf9   :  { %368 = vst.msk [vmem:[%s1248_s2 + $0x10] sm:$0xf] %vm367_vm4, %v363_v40 }
  0xfa   :  { %v371_v45 = vmul.f32 0.022222223, %v360_v43 }
  0xfb   :  { %v627_v46 = vpop.f32.mrb[12].mxu1 }
  0xfc   :  { %374 = vst.msk [vmem:[%s1249_s3 + $0x10] sm:$0xf] %vm367_vm4, %v371_v45  ;;  %v952_v47 = vpop.f32.mrb[13].mxu1 }
  0xff   :  { %v632_v48 = vpop.f32.mrb[14].mxu1 }
 0x100   :  { %v955_v49 = vpop.f32.mrb[15].mxu1 }
 0x103   :  { %v637_v50 = vpop.f32.mrb[16].mxu1 }
 0x104   :  { %v958_v51 = vpop.f32.mrb[17].mxu1 }
 0x106   :  { %v547_v52 = vpop.f32.mrb[6].mxu0 }
 0x107   :  { %v724_v53 = vmul.f32 0.022222223, %v547_v52  ;;  %v707_v54 = vpop.f32.mrb[18].mxu1  ;;  %v937_v55 = vpop.f32.mrb[7].mxu0 }
 0x108   :  { %v721_v56 = vsub.f32 %v627_v46, %v707_v54  ;;  %v967_v57 = vpop.f32.mrb[19].mxu1 }
 0x109   :  { %800 = vst.msk [vmem:[%s1248_s2 + $0x18] sm:$0xff] %vm364_vm3, %v724_v53 }
 0x10a   :  { %v731_v58 = vmul.f32 0.022222223, %v721_v56  ;;  %v552_v59 = vpop.f32.mrb[8].mxu0 }
 0x10b   :  { %v725_v60 = vmul.f32 0.022222223, %v552_v59  ;;  %v712_v61 = vpop.f32.mrb[20].mxu1  ;;  %v940_v62 = vpop.f32.mrb[9].mxu0 }
 0x10c   :  { %803 = vst.msk [vmem:[%s1249_s3 + $0x18] sm:$0xff] %vm364_vm3, %v731_v58  ;;  %v722_v63 = vsub.f32 %v632_v48, %v712_v61  ;;  %v970_v0 = vpop.f32.mrb[21].mxu1 }
 0x10d   :  { %801 = vst.msk [vmem:[%s1248_s2 + $0x20] sm:$0xff] %vm364_vm3, %v725_v60 }
 0x10e   :  { %v732_v1 = vmul.f32 0.022222223, %v722_v63  ;;  %v557_v2 = vpop.f32.mrb[10].mxu0 }
 0x10f   :  { %v726_v3 = vmul.f32 0.022222223, %v557_v2  ;;  %v717_v4 = vpop.f32.mrb[22].mxu1  ;;  %v943_v5 = vpop.f32.mrb[11].mxu0 }
 0x110   :  { %804 = vst.msk [vmem:[%s1249_s3 + $0x20] sm:$0xff] %vm364_vm3, %v732_v1  ;;  %v723_v6 = vsub.f32 %v637_v50, %v717_v4  ;;  %v973_v7 = vpop.f32.mrb[23].mxu1 }
 0x111   :  { %802 = vst.msk [vmem:[%s1248_s2 + $0x28] sm:$0xf] %vm367_vm4, %v726_v3 }
 0x112   :  { %v733_v8 = vmul.f32 0.022222223, %v723_v6 }
 0x114   :  { %805 = vst.msk [vmem:[%s1249_s3 + $0x28] sm:$0xf] %vm367_vm4, %v733_v8 }

</bundles_post_ra>
